<compile_context>
chip_gen: v7x
topology: tpu7x:2x2x1
jax: 0.10.0
libtpu: 0.0.40
codegen_flags: <defaults>
</compile_context>

<pallas_src>
import functools

import jax
import jax.numpy as jnp
from jax.experimental import pallas as pl
from jax.experimental.pallas import tpu as pltpu

_LANE = 128      # output / hidden dims padded to lane-dense multiples of 128
_SUBLANE = 8     # batch tile granularity


def _round_up(x: int, m: int) -> int:
    return ((x + m - 1) // m) * m


def _vmem_capacity_bytes() -> int:
    """Physical VMEM of the current chip; conservative 64 MiB (v7x per-TC) fallback."""
    try:
        info = pltpu.get_tpu_info()
        cap = getattr(info, "vmem_capacity_bytes", None)
        if cap:
            return int(cap)
    except Exception:
        pass
    return 64 << 20


@functools.lru_cache(maxsize=1)
def _default_batch_tile() -> int:
    """128 on v5e (4x128 MXU, small scoped-VMEM default), 256 on v6e/v7x (2x256 MXU)."""
    try:
        kind = jax.devices()[0].device_kind.lower()
        if "v5 lite" in kind or "v5e" in kind or "v5lite" in kind:
            return 128
    except Exception:
        pass
    return 256


def _probe_buffered_single() -> bool:
    """One-time probe: does this JAX build accept pipeline_mode=pl.Buffered(1)?

    Done once at import with a trivial 8x128 kernel so the real forward never pays a
    second trace/compile and real compile errors (e.g. VMEM OOM) are never swallowed.
    """
    if not hasattr(pl, "Buffered"):
        return False

    def k(x_ref, o_ref):
        o_ref[...] = x_ref[...] * 2.0

    try:
        f = pl.pallas_call(
            k,
            out_shape=jax.ShapeDtypeStruct((_SUBLANE, _LANE), jnp.float32),
            grid=(2,),
            in_specs=[pl.BlockSpec((_SUBLANE, _LANE), lambda i: (0, 0),
                                   pipeline_mode=pl.Buffered(1))],
            out_specs=pl.BlockSpec((_SUBLANE, _LANE), lambda i: (0, 0)),
        )
        jax.block_until_ready(f(jnp.ones((_SUBLANE, _LANE), jnp.float32)))
        return True
    except Exception:
        return False


_HAS_BUFFERED_1 = _probe_buffered_single()


def _pad_to(a, shape, dtype):
    """Zero-pad a 2-D array up to `shape`, casting to `dtype` (one-time prep only)."""
    out = jnp.zeros(shape, dtype)
    return out.at[: a.shape[0], : a.shape[1]].set(a.astype(dtype))


def prepare_dqn_params(params, *, mm_dtype=jnp.bfloat16):
    """One-time padding + casting of DQN weights for the Pallas kernel.

    Call ONCE (per weight update) and reuse the result across forward calls; doing
    this per-call roughly doubles the dominant weight HBM traffic.

    Padding is exact: padded weight rows/cols and bias entries are zero, so padded
    hidden units stay zero through ReLU and contribute nothing; padded outputs are
    sliced off in dqn_forward. w1 keeps K = state_dim unpadded (MXU handles K < 128).

    mm_dtype: jnp.bfloat16 (default, all TPU generations) or jnp.float32 (exact).
    # TODO(synk): jnp.float8_e4m3fn weight-only option for v7x (fp8 MXU) once the
    # accuracy budget is validated; halves weight DMA again vs bf16.
    """
    D, H1 = params["w1"].shape
    H2 = params["w2"].shape[1]
    A = params["w3"].shape[1]
    H1p, H2p, Ap = (_round_up(d, _LANE) for d in (H1, H2, A))
    prepped = {
        "w1": _pad_to(params["w1"], (D, H1p), mm_dtype),
        "b1": _pad_to(params["b1"], (1, H1p), jnp.float32),
        "w2": _pad_to(params["w2"], (H1p, H2p), mm_dtype),
        "b2": _pad_to(params["b2"], (1, H2p), jnp.float32),
        "w3": _pad_to(params["w3"], (H2p, Ap), mm_dtype),
        "b3": _pad_to(params["b3"], (1, Ap), jnp.float32),
    }
    return jax.tree_util.tree_map(jax.block_until_ready, prepped)


def _dqn_mlp_kernel(x_ref, w1_ref, b1_ref, w2_ref, b2_ref, w3_ref, b3_ref,
                    o_ref, *, q_value_clipping: float):
    """Fused 3-layer MLP on one batch tile: (Linear+ReLU) x2 + Linear (+ optional clip).

    Matmuls run on the MXU in the weight dtype with f32 accumulation; elementwise math
    (bias add, ReLU, clip) stays f32 (v5e has no bf16 VPU). Activations are cast to the
    weight dtype only at each dot.
    """
    mm = w1_ref.dtype
    h = jnp.dot(x_ref[...].astype(mm), w1_ref[...],
                preferred_element_type=jnp.float32)                      # (tb, H1p)
    h = jnp.maximum(h + b1_ref[...], 0.0)
    h = jnp.dot(h.astype(mm), w2_ref[...],
                preferred_element_type=jnp.float32)                      # (tb, H2p)
    h = jnp.maximum(h + b2_ref[...], 0.0)
    q = jnp.dot(h.astype(mm), w3_ref[...],
                preferred_element_type=jnp.float32)                      # (tb, Ap)
    q = q + b3_ref[...]
    if q_value_clipping > 0.0:
        q = jnp.minimum(q, q_value_clipping)   # torch .clip(min=None, max=clip)
    o_ref[...] = q.astype(o_ref.dtype)


def dqn_forward(state_batch, prepared_params, *, action_dim: int,
                q_value_clipping: float = 0.0, batch_tile: int | None = None):
    """Equivalent of DQN.forward for ACTIONS_IN_ACTION_SPACE.

    Args:
      state_batch: (batch, state_dim) float32
      prepared_params: output of prepare_dqn_params (padded + cast once, reused)
      action_dim: original (unpadded) action dimension
      q_value_clipping: clip max q-value if > 0 (as in the PyTorch module)
      batch_tile: rows per grid step for large batches (default: chip-dependent)

    Returns:
      (q_values, None) with q_values of shape (batch, action_dim), float32
    """
    B, D = state_batch.shape
    p = prepared_params
    assert p["w1"].shape[0] == D, "state_dim mismatch with prepared params"
    H1p = p["w1"].shape[1]
    H2p = p["w2"].shape[1]
    Ap = p["w3"].shape[1]
    mm_isz = jnp.dtype(p["w1"].dtype).itemsize

    if batch_tile is None:
        batch_tile = _default_batch_tile()

    # TC-/grid-aware batch tiling: small, weight-DMA-bound batches run as ONE grid step
    # (don't duplicate the resident weight set per step / per v7x TC); large,
    # compute-bound batches tile at batch_tile rows so a "parallel" grid feeds both TCs.
    split_threshold = max(512, 2 * batch_tile)
    if B < split_threshold:
        tb = _round_up(max(B, _SUBLANE), _SUBLANE)
    else:
        tb = batch_tile
    Bp = _round_up(B, tb)
    grid = (Bp // tb,)

    if Bp != B:
        # Batch-dim-only pad (no host-side feature padding of x); fuses under jit.
        state_batch = jnp.pad(state_batch, ((0, Bp - B), (0, 0)))

    single_buffer = _HAS_BUFFERED_1
    w_buf = 1 if single_buffer else 2
    weight_bytes = (D * H1p + H1p * H2p + H2p * Ap) * mm_isz + (H1p + H2p + Ap) * 4
    io_bytes = 2 * tb * D * 4 + 2 * tb * Ap * 4            # double-buffered x / out tiles
    act_bytes = 2 * tb * max(H1p, H2p) * 4                 # intermediate activations
    need = w_buf * weight_bytes + io_bytes + act_bytes + (4 << 20)
    cap = _vmem_capacity_bytes()
    if need > int(0.9 * cap):
        # TODO(synk): add hidden-dim (N) tiling with K-reduction for weights that don't
        # fit resident in VMEM (e.g. hidden=[4096,4096] f32 on v7x's 64 MiB per-TC).
        raise ValueError(
            f"DQN weights ({weight_bytes / 2**20:.1f} MiB x{w_buf} buffers) exceed the "
            f"VMEM budget ({cap / 2**20:.0f} MiB); use bf16 weights or smaller hidden "
            f"layer sizes.")
    vmem_limit = int(need)

    w_kwargs = dict(pipeline_mode=pl.Buffered(1)) if single_buffer else {}

    grid_spec = pltpu.PrefetchScalarGridSpec(
        num_scalar_prefetch=0,
        grid=grid,
        in_specs=[
            pl.BlockSpec((tb, D), lambda i: (i, 0)),                  # x tile (K = D)
            pl.BlockSpec((D, H1p), lambda i: (0, 0), **w_kwargs),     # w1
            pl.BlockSpec((1, H1p), lambda i: (0, 0), **w_kwargs),     # b1
            pl.BlockSpec((H1p, H2p), lambda i: (0, 0), **w_kwargs),   # w2
            pl.BlockSpec((1, H2p), lambda i: (0, 0), **w_kwargs),     # b2
            pl.BlockSpec((H2p, Ap), lambda i: (0, 0), **w_kwargs),    # w3
            pl.BlockSpec((1, Ap), lambda i: (0, 0), **w_kwargs),      # b3
        ],
        out_specs=pl.BlockSpec((tb, Ap), lambda i: (i, 0)),           # lane-dense out
    )

    cost = pl.CostEstimate(
        flops=2 * Bp * (D * H1p + H1p * H2p + H2p * Ap),
        transcendentals=0,
        bytes_accessed=int(Bp * D * 4 + Bp * Ap * 4 + weight_bytes),
    )

    kernel = functools.partial(_dqn_mlp_kernel,
                               q_value_clipping=float(q_value_clipping))

    q_padded = pl.pallas_call(
        kernel,
        out_shape=jax.ShapeDtypeStruct((Bp, Ap), jnp.float32),
        grid_spec=grid_spec,
        compiler_params=pltpu.CompilerParams(
            dimension_semantics=("parallel",),
            vmem_limit_bytes=vmem_limit,
        ),
        cost_estimate=cost,
    )(state_batch, p["w1"], p["b1"], p["w2"], p["b2"], p["w3"], p["b3"])

    return q_padded[:B, :action_dim], None   # DQN.forward returns (output, None)


def init_dqn_params(key, state_dim, hidden_layer_sizes, action_dim):
    """Deterministic init matching nn.Linear's default U(-1/sqrt(fan_in), 1/sqrt(fan_in)).

    Weights are stored transposed relative to PyTorch: (in_features, out_features).
    """
    sizes = [state_dim] + list(hidden_layer_sizes) + [action_dim]
    params = {}
    for idx in range(len(sizes) - 1):
        fan_in, fan_out = sizes[idx], sizes[idx + 1]
        key, wk, bk = jax.random.split(key, 3)
        bound = 1.0 / jnp.sqrt(fan_in)
        params[f"w{idx + 1}"] = jax.random.uniform(
            wk, (fan_in, fan_out), jnp.float32, -bound, bound)
        params[f"b{idx + 1}"] = jax.random.uniform(
            bk, (1, fan_out), jnp.float32, -bound, bound)
    return params


def _reference_forward(x, params, q_value_clipping=0.0):
    """Plain-JAX reference for correctness checking."""
    h = jnp.maximum(x @ params["w1"] + params["b1"], 0.0)
    h = jnp.maximum(h @ params["w2"] + params["b2"], 0.0)
    q = h @ params["w3"] + params["b3"]
    if q_value_clipping > 0.0:
        q = jnp.minimum(q, q_value_clipping)
    return q


if __name__ == "__main__":
    key = jax.random.PRNGKey(0)

    # Small, module-consistent shapes (scaled-down analog of hidden=[1024, 1024]).
    batch = 16
    state_dim = 32
    hidden_layer_sizes = [64, 64]
    action_dim = 16

    pkey, xkey = jax.random.split(key)
    params = init_dqn_params(pkey, state_dim, hidden_layer_sizes, action_dim)
    x = jax.random.normal(xkey, (batch, state_dim), jnp.float32)
    ref = _reference_forward(x, params)

    # --- f32 weight path (exact vs reference) ---------------------------------------
    prepped_f32 = prepare_dqn_params(params, mm_dtype=jnp.float32)
    fwd_f32 = jax.jit(functools.partial(dqn_forward, action_dim=action_dim))
    q_values, intent = fwd_f32(x, prepped_f32)
    q_values = jax.block_until_ready(q_values)
    assert q_values.shape == (batch, action_dim)
    assert intent is None
    assert jnp.allclose(q_values, ref, atol=1e-4, rtol=1e-4), "f32 mismatch vs reference"

    # Non-multiple-of-8 batch (exercises batch padding + output slicing).
    q_small, _ = fwd_f32(x[:10], prepped_f32)
    q_small = jax.block_until_ready(q_small)
    assert q_small.shape == (10, action_dim)
    assert jnp.allclose(q_small, ref[:10], atol=1e-4, rtol=1e-4), "padded-batch mismatch"

    # q-value clipping path.
    fwd_clip = jax.jit(functools.partial(dqn_forward, action_dim=action_dim,
                                         q_value_clipping=0.5))
    q_clip = jax.block_until_ready(fwd_clip(x, prepped_f32)[0])
    ref_clip = _reference_forward(x, params, q_value_clipping=0.5)
    assert jnp.allclose(q_clip, ref_clip, atol=1e-4, rtol=1e-4), "clip mismatch"

    # --- bf16 default path (MXU fast path on all generations, f32 accumulate) --------
    prepped_bf16 = prepare_dqn_params(params)   # bf16 is the default
    fwd_bf16 = jax.jit(functools.partial(dqn_forward, action_dim=action_dim))
    q_bf16 = jax.block_until_ready(fwd_bf16(x, prepped_bf16)[0])
    assert jnp.allclose(q_bf16, ref, atol=0.1, rtol=0.1), "bf16 mismatch vs reference"

    # TODO(synk): ACTIONS_IN_STATE_SPACE path (pad_and_mask over PackedSequence), the
    # GRU/attention encoders of DQNNetwork, and epsilon-greedy action selection are
    # host-side / RNN / control logic not exercised by this forward; only the MLP hot
    # path is implemented in the kernel.
    print("KERNEL_OK")
</pallas_src>

<mosaic_0001>
module attributes {stable_mosaic.version = 11 : i64} {
  func.func @k(%arg0: i32, %arg1: memref<8x128xf32, #tpu.memory_space<vmem>>, %arg2: memref<8x128xf32, #tpu.memory_space<vmem>>) attributes {dimension_semantics = [#tpu.dimension_semantics<arbitrary>], iteration_bounds = array<i64: 2>, scalar_prefetch = 0 : i64, scratch_operands = 0 : i64, tpu.core_type = #tpu.core_type<tc>, window_params = [{pipeline_mode = #tpu.pipeline_mode<synchronous>, transform_indices = @transform_0, window_bounds = array<i64: 8, 128>}, {pipeline_mode = #tpu.pipeline_mode<synchronous>, transform_indices = @transform_1, window_bounds = array<i64: 8, 128>}]} {
    %c0 = arith.constant 0 : index
    %c0_0 = arith.constant 0 : index
    %0 = vector.load %arg1[%c0, %c0_0] : memref<8x128xf32, #tpu.memory_space<vmem>>, vector<8x128xf32>
    %cst = arith.constant 2.000000e+00 : f32
    %1 = vector.broadcast %cst : f32 to vector<8x128xf32>
    %2 = arith.mulf %0, %1 : vector<8x128xf32>
    %c0_1 = arith.constant 0 : index
    %c0_2 = arith.constant 0 : index
    %3 = vector.load %arg2[%c0_1, %c0_2] : memref<8x128xf32, #tpu.memory_space<vmem>>, vector<8x128xf32>
    tpu.vector_store %arg2[%c0_1, %c0_2], %2 {strides = array<i32>} : memref<8x128xf32, #tpu.memory_space<vmem>>, vector<8x128xf32>,
    return
  }
  func.func @transform_0(%arg0: i32) -> (i32, i32) {
    %c0_i32 = arith.constant 0 : i32
    %c0_i32_0 = arith.constant 0 : i32
    %c0_i32_1 = arith.constant 0 : i32
    return %c0_i32, %c0_i32_0 : i32, i32
  }
  func.func @transform_1(%arg0: i32) -> (i32, i32) {
    %c0_i32 = arith.constant 0 : i32
    %c0_i32_0 = arith.constant 0 : i32
    %c0_i32_1 = arith.constant 0 : i32
    return %c0_i32, %c0_i32_0 : i32, i32
  }
}

module attributes {stable_mosaic.version = 11 : i64} {
  func.func @_dqn_mlp_kernel(%arg0: i32, %arg1: memref<16x32xf32, #tpu.memory_space<vmem>>, %arg2: memref<32x128xf32, #tpu.memory_space<vmem>>, %arg3: memref<1x128xf32, #tpu.memory_space<vmem>>, %arg4: memref<128x128xf32, #tpu.memory_space<vmem>>, %arg5: memref<1x128xf32, #tpu.memory_space<vmem>>, %arg6: memref<128x128xf32, #tpu.memory_space<vmem>>, %arg7: memref<1x128xf32, #tpu.memory_space<vmem>>, %arg8: memref<16x128xf32, #tpu.memory_space<vmem>>) attributes {dimension_semantics = [#tpu.dimension_semantics<parallel>], iteration_bounds = array<i64: 1>, scalar_prefetch = 0 : i64, scratch_operands = 0 : i64, tpu.core_type = #tpu.core_type<tc>, window_params = [{transform_indices = @transform_0, window_bounds = array<i64: 16, 32>}, {pipeline_mode = #tpu.pipeline_mode<synchronous>, transform_indices = @transform_1, window_bounds = array<i64: 32, 128>}, {pipeline_mode = #tpu.pipeline_mode<synchronous>, transform_indices = @transform_2, window_bounds = array<i64: 1, 128>}, {pipeline_mode = #tpu.pipeline_mode<synchronous>, transform_indices = @transform_3, window_bounds = array<i64: 128, 128>}, {pipeline_mode = #tpu.pipeline_mode<synchronous>, transform_indices = @transform_4, window_bounds = array<i64: 1, 128>}, {pipeline_mode = #tpu.pipeline_mode<synchronous>, transform_indices = @transform_5, window_bounds = array<i64: 128, 128>}, {pipeline_mode = #tpu.pipeline_mode<synchronous>, transform_indices = @transform_6, window_bounds = array<i64: 1, 128>}, {transform_indices = @transform_7, window_bounds = array<i64: 16, 128>}]} {
    %c0 = arith.constant 0 : index
    %c0_0 = arith.constant 0 : index
    %0 = vector.load %arg1[%c0, %c0_0] : memref<16x32xf32, #tpu.memory_space<vmem>>, vector<16x32xf32>
    %c0_1 = arith.constant 0 : index
    %c0_2 = arith.constant 0 : index
    %1 = vector.load %arg2[%c0_1, %c0_2] : memref<32x128xf32, #tpu.memory_space<vmem>>, vector<32x128xf32>
    %cst = arith.constant dense<0.000000e+00> : vector<16x128xf32>
    %2 = tpu.matmul %0, %1, %cst {dimension_numbers = #tpu.dot_dimension_numbers<[1], [0], [0], [1], [0, 0, 1, 1], [], []>} : vector<16x32xf32>, vector<32x128xf32>, vector<16x128xf32> -> vector<16x128xf32>
    %c0_3 = arith.constant 0 : index
    %c0_4 = arith.constant 0 : index
    %3 = vector.load %arg3[%c0_3, %c0_4] : memref<1x128xf32, #tpu.memory_space<vmem>>, vector<1x128xf32>
    %4 = vector.broadcast %3 : vector<1x128xf32> to vector<16x128xf32>
    %5 = arith.addf %2, %4 : vector<16x128xf32>
    %cst_5 = arith.constant 0.000000e+00 : f32
    %6 = vector.broadcast %cst_5 : f32 to vector<16x128xf32>
    %7 = arith.maximumf %5, %6 : vector<16x128xf32>
    %c0_6 = arith.constant 0 : index
    %c0_7 = arith.constant 0 : index
    %8 = vector.load %arg4[%c0_6, %c0_7] : memref<128x128xf32, #tpu.memory_space<vmem>>, vector<128x128xf32>
    %cst_8 = arith.constant dense<0.000000e+00> : vector<16x128xf32>
    %9 = tpu.matmul %7, %8, %cst_8 {dimension_numbers = #tpu.dot_dimension_numbers<[1], [0], [0], [1], [0, 0, 1, 1], [], []>} : vector<16x128xf32>, vector<128x128xf32>, vector<16x128xf32> -> vector<16x128xf32>
    %c0_9 = arith.constant 0 : index
    %c0_10 = arith.constant 0 : index
    %10 = vector.load %arg5[%c0_9, %c0_10] : memref<1x128xf32, #tpu.memory_space<vmem>>, vector<1x128xf32>
    %11 = vector.broadcast %10 : vector<1x128xf32> to vector<16x128xf32>
    %12 = arith.addf %9, %11 : vector<16x128xf32>
    %cst_11 = arith.constant 0.000000e+00 : f32
    %13 = vector.broadcast %cst_11 : f32 to vector<16x128xf32>
    %14 = arith.maximumf %12, %13 : vector<16x128xf32>
    %c0_12 = arith.constant 0 : index
    %c0_13 = arith.constant 0 : index
    %15 = vector.load %arg6[%c0_12, %c0_13] : memref<128x128xf32, #tpu.memory_space<vmem>>, vector<128x128xf32>
    %cst_14 = arith.constant dense<0.000000e+00> : vector<16x128xf32>
    %16 = tpu.matmul %14, %15, %cst_14 {dimension_numbers = #tpu.dot_dimension_numbers<[1], [0], [0], [1], [0, 0, 1, 1], [], []>} : vector<16x128xf32>, vector<128x128xf32>, vector<16x128xf32> -> vector<16x128xf32>
    %c0_15 = arith.constant 0 : index
    %c0_16 = arith.constant 0 : index
    %17 = vector.load %arg7[%c0_15, %c0_16] : memref<1x128xf32, #tpu.memory_space<vmem>>, vector<1x128xf32>
    %18 = vector.broadcast %17 : vector<1x128xf32> to vector<16x128xf32>
    %19 = arith.addf %16, %18 : vector<16x128xf32>
    %c0_17 = arith.constant 0 : index
    %c0_18 = arith.constant 0 : index
    %20 = vector.load %arg8[%c0_17, %c0_18] : memref<16x128xf32, #tpu.memory_space<vmem>>, vector<16x128xf32>
    tpu.vector_store %arg8[%c0_17, %c0_18], %19 {strides = array<i32>} : memref<16x128xf32, #tpu.memory_space<vmem>>, vector<16x128xf32>,
    return
  }
  func.func @transform_0(%arg0: i32) -> (i32, i32) {
    %c0_i32 = arith.constant 0 : i32
    %c0_i32_0 = arith.constant 0 : i32
    return %arg0, %c0_i32 : i32, i32
  }
  func.func @transform_1(%arg0: i32) -> (i32, i32) {
    %c0_i32 = arith.constant 0 : i32
    %c0_i32_0 = arith.constant 0 : i32
    %c0_i32_1 = arith.constant 0 : i32
    return %c0_i32, %c0_i32_0 : i32, i32
  }
  func.func @transform_2(%arg0: i32) -> (i32, i32) {
    %c0_i32 = arith.constant 0 : i32
    %c0_i32_0 = arith.constant 0 : i32
    %c0_i32_1 = arith.constant 0 : i32
    return %c0_i32, %c0_i32_0 : i32, i32
  }
  func.func @transform_3(%arg0: i32) -> (i32, i32) {
    %c0_i32 = arith.constant 0 : i32
    %c0_i32_0 = arith.constant 0 : i32
    %c0_i32_1 = arith.constant 0 : i32
    return %c0_i32, %c0_i32_0 : i32, i32
  }
  func.func @transform_4(%arg0: i32) -> (i32, i32) {
    %c0_i32 = arith.constant 0 : i32
    %c0_i32_0 = arith.constant 0 : i32
    %c0_i32_1 = arith.constant 0 : i32
    return %c0_i32, %c0_i32_0 : i32, i32
  }
  func.func @transform_5(%arg0: i32) -> (i32, i32) {
    %c0_i32 = arith.constant 0 : i32
    %c0_i32_0 = arith.constant 0 : i32
    %c0_i32_1 = arith.constant 0 : i32
    return %c0_i32, %c0_i32_0 : i32, i32
  }
  func.func @transform_6(%arg0: i32) -> (i32, i32) {
    %c0_i32 = arith.constant 0 : i32
    %c0_i32_0 = arith.constant 0 : i32
    %c0_i32_1 = arith.constant 0 : i32
    return %c0_i32, %c0_i32_0 : i32, i32
  }
  func.func @transform_7(%arg0: i32) -> (i32, i32) {
    %c0_i32 = arith.constant 0 : i32
    %c0_i32_0 = arith.constant 0 : i32
    return %arg0, %c0_i32 : i32, i32
  }
}

</mosaic_0001>

<bundles_post_ra>
// kernel: tpu_custom_call.1
= control target key start
LH: loop header
LB: loop body
LE: loop exit
PB: predicated region body
PF: predicated region fallthrough
CT: control target
= control target key end

     0   :  { %6 = vsyncpa [#allocation3], 0  ;;  %s341_s0 = inlined_call_operand.hbm [shape: f32[8,128], index: 0, kind: input, shape index: {}]   ;;  %s342_s1 = inlined_call_operand.hbm [shape: f32[8,128], index: 1, kind: output, shape index: {}]  }
   0x1   :  { %7 = vsyncpa [#allocation4], 0  ;;  %s262_s6 = smov 0  }
   0x2 LB: > { %s145_s7 = sadd.s32 4294967295, %s248_s6   ;;  %p146_p0 = scmp.ge.s32.totalorder %s248_s6, 1  ;;  %s248_s6 = sphi %s262_s6, %s13_s6  }
   0x3   : > { %p60_p1 = scmp.lt.s32.totalorder %s248_s6, 3  ;;  %p276_p3 = scmp.eq.s32.totalorder %s145_s7, 0 }
   0x4   : > { %s250_s10 = smov [#allocation2]   ;;  %s180_s15 = scalar_lea.hbm %s341_s0, 128 }
   0x5   : > { %p270_p2 = pnand %p146_p0, %p60_p1  ;;  %s73_s11 = sshll.u32 %s250_s10, 4  ;;  %s74_s11 = int_to_ptr.vmem [resolvable:$true] %s73_s11 }
   0x6   : > { %s347_s9 = scalar_select %p276_p3, 1, 0 }
   0x7   : > { %s346_s8 = scalar_select %p270_p2, 1, 0 }
   0x8   : > { %p162_p4 = pneg %p270_p2  ;;  %p181_p6 = scmp.ne.s32.totalorder %s341_s0, %s180_s15 }
   0x9   : > { %p187_p10 = scmp.lt.u32.totalorder %s180_s15, %s341_s0 }
   0xa   : > { %p284_p5 = pnand %p276_p3, %p162_p4 }
   0xc   : > { %p182_p7 = pneg %p284_p5 }
   0xe   : > { %p183_p8 = pnand %p182_p7, %p181_p6 }
  0x10   : > { %p184_p9 = pneg %p183_p8 }
  0x12   : > { %p189_p11 = pnand %p187_p10, %p184_p9 }
  0x14   : > { %192 = shalt.err (!%p189_p11)
}
  0x15   : > { %s193_s20 = scalar_lea.vmem %s74_s11, 128  ;;  %p201_p1 = scmp.lt.s32.totalorder %s74_s11, %s74_s11 }
  0x16   : > { %p194_p12 = scmp.ne.s32.totalorder %s74_s11, %s193_s20  ;;  %p202_p4 = scmp.lt.s32.totalorder %s193_s20, %s193_s20 }
  0x18   : > { %p196_p13 = pnand %p194_p12, %p182_p7  ;;  %p203_p3 = por %p202_p4, %p201_p1 }
  0x1a   : > { %p197_p0 = pneg %p196_p13 }
  0x1c   : > { %p204_p2 = pnand %p203_p3, %p197_p0 }
  0x1e   : > { %207 = shalt.err (!%p204_p2)
}
  0x1f   : > { %165 = dma.hbm_to_vmem [thread:$0]  (!%p284_p5), %s341_s0, 128, %s74_s11, [#allocation3]  }
  0x20   : > { %p349_p6 = scmp.ne.s32.totalorder %s346_s8, 0 }
  0x21   : > { %p350_p8 = scmp.ne.s32.totalorder (!%p349_p6), %s347_s9, 0 }
  0x22   : > { %86 = sbr.rel (%p349_p6) target bundleno = 67 (0x43), region = 24 }
  0x29   : > { %239 = dma.done.wait (%p350_p8), [#allocation3], 128  }
  0x2a   : > { %241 = vsyncadd (%p350_p8), [#allocation3], 4294967168  ;;  %s251_s23 = smov [#allocation5]   ;;  %v96_v0 = vld [vmem:[#allocation2] sm:$0xff]  ;;  %p312_p2 = scmp.eq.s32.totalorder %s145_s7, 1 }
  0x2b   : > { %s106_s24 = sshll.u32 %s251_s23, 4  ;;  %v97_v1 = vmul.f32 2.0, %v96_v0  ;;  %s107_s24 = int_to_ptr.vmem [resolvable:$true] %s106_s24 }
  0x2c   : > { %s208_s26 = scalar_lea.vmem %s107_s24, 128  ;;  %p215_p9 = scmp.lt.s32.totalorder %s107_s24, %s107_s24 }
  0x2d   : > { %98 = vst [vmem:[#allocation5] sm:$0xff] %v97_v1  ;;  %p209_p3 = scmp.ne.s32.totalorder %s107_s24, %s208_s26  ;;  %p216_p10 = scmp.lt.s32.totalorder %s208_s26, %s208_s26 }
  0x2f   : > { %p210_p5 = pnand %p209_p3, %p312_p2  ;;  %p217_p11 = por %p216_p10, %p215_p9 }
  0x31   : > { %p211_p7 = pneg %p210_p5 }
  0x33   : > { %p218_p12 = pnand %p217_p11, %p211_p7 }
  0x35   : > { %221 = shalt.err (!%p218_p12)
}
  0x36   : > { %s222_s29 = scalar_lea.hbm %s342_s1, 128 }
  0x37   : > { %p223_p13 = scmp.ne.s32.totalorder %s342_s1, %s222_s29  ;;  %p228_p4 = scmp.lt.u32.totalorder %s222_s29, %s342_s1 }
  0x39   : > { %p224_p0 = pnand %p223_p13, %p312_p2 }
  0x3b   : > { %p225_p1 = pneg %p224_p0 }
  0x3d   : > { %p230_p6 = pnand %p228_p4, %p225_p1 }
  0x3f   : > { %233 = shalt.err (!%p230_p6)
}
  0x40   : > { %159 = dma.vmem_to_hbm [thread:$0]  (%p312_p2), %s107_s24, 128, %s342_s1, [#allocation4]  }
  0x41   : > { %243 = dma.done.wait (%p312_p2), [#allocation4], 128  }
  0x42   : > { %245 = vsyncadd (%p312_p2), [#allocation4], 4294967168 }
  0x43 PF: > { %s13_s6 = sadd.s32 1, %s248_s6  }
  0x44   : > { %p10_p8 = scmp.ge.s32.totalorder %s13_s6, 4  }
  0x46   :  { %12 = sbr.rel (!%p10_p8) target bundleno = 2 (0x2), region = 53 }
  0x4d   :  { %119 = vsyncpa [#allocation3], 1 }
  0x4e   :  { %121 = vsyncpa [#allocation3 + $0x1], 1 }
  0x4f   :  { %122 = vsyncpa [#allocation4], 1 }
  0x50   :  { %124 = vsyncpa [#allocation4 + $0x1], 1 }

// kernel: dqn_forward.1
= control target key start
LH: loop header
LB: loop body
LE: loop exit
PB: predicated region body
PF: predicated region fallthrough
CT: control target
= control target key end

     0   :  { %12 = vsyncpa [#allocation3], 0  ;;  %s870_s0 = inlined_call_operand.hbm [shape: f32[16,32], index: 0, kind: input, shape index: {}]   ;;  %s871_s1 = inlined_call_operand.hbm [shape: f32[32,128], index: 1, kind: input, shape index: {}]   ;;  %s872_s2 = inlined_call_operand.vmem [shape: f32[1,128], index: 2, kind: input, shape index: {}]   ;;  %s873_s3 = inlined_call_operand.hbm [shape: f32[128,128], index: 3, kind: input, shape index: {}]   ;;  %s874_s4 = inlined_call_operand.vmem [shape: f32[1,128], index: 4, kind: input, shape index: {}]   ;;  %s875_s5 = inlined_call_operand.hbm [shape: f32[128,128], index: 5, kind: input, shape index: {}]   ;;  %s876_s6 = inlined_call_operand.vmem [shape: f32[1,128], index: 6, kind: input, shape index: {}]   ;;  %s877_s7 = inlined_call_operand.hbm [shape: f32[16,128], index: 7, kind: output, shape index: {}]  }
   0x1   :  { %13 = vsyncpa [#allocation6], 0 }
   0x2   :  { %14 = vsyncpa [#allocation9], 0 }
   0x3   :  { %15 = vsyncpa [#allocation4], 0  ;;  %s723_s24 = smov [#allocation5]   ;;  %s724_s26 = smov [#allocation2]  }
   0x4   :  { %s33_s25 = sshll.u32 %s723_s24, 4  ;;  %s21_s27 = sshll.u32 %s724_s26, 4  ;;  %s34_s25 = int_to_ptr.vmem [resolvable:$true] %s33_s25  ;;  %s770_s27 = int_to_ptr.vmem [resolvable:$true] %s21_s27 }
   0x5   :  { %s605_s30 = scalar_lea.hbm %s871_s1, 512 }
   0x6   :  { %p606_p0 = scmp.ne.s32.totalorder %s871_s1, %s605_s30  ;;  %p609_p1 = scmp.lt.u32.totalorder %s605_s30, %s871_s1 }
   0x8   :  { %p611_p2 = pnand %p609_p1, %p606_p0 }
   0xa   :  { %614 = shalt.err (!%p611_p2)
}
   0xb   :  { %s615_s12 = scalar_lea.vmem %s34_s25, 512  ;;  %p620_p4 = scmp.lt.s32.totalorder %s34_s25, %s34_s25 }
   0xc   :  { %p616_p3 = scmp.ne.s32.totalorder %s34_s25, %s615_s12  ;;  %p621_p5 = scmp.lt.s32.totalorder %s615_s12, %s615_s12 }
   0xe   :  { %p622_p6 = por %p621_p5, %p620_p4 }
  0x10   :  { %p623_p7 = pnand %p622_p6, %p616_p3 }
  0x12   :  { %626 = shalt.err (!%p623_p7)
}
  0x13   :  { %s725_s13 = smov 128   ;;  %s726_s14 = smov 8  }
  0x14   :  { %39 = dma.hbm_to_vmem [thread:$0]  %s871_s1, 512, %s34_s25, [#allocation6], %s725_s13, %s725_s13, %s726_s14  }
  0x15   :  { %s627_s19 = scalar_lea.hbm %s870_s0, 256 }
  0x16   :  { %p628_p8 = scmp.ne.s32.totalorder %s870_s0, %s627_s19  ;;  %p631_p9 = scmp.lt.u32.totalorder %s627_s19, %s870_s0 }
  0x18   :  { %p633_p10 = pnand %p631_p9, %p628_p8 }
  0x1a   :  { %636 = shalt.err (!%p633_p10)
}
  0x1b   :  { %s637_s24 = scalar_lea.vmem %s770_s27, 256  ;;  %p642_p12 = scmp.lt.s32.totalorder %s770_s27, %s770_s27 }
  0x1c   :  { %p638_p11 = scmp.ne.s32.totalorder %s770_s27, %s637_s24  ;;  %p643_p13 = scmp.lt.s32.totalorder %s637_s24, %s637_s24 }
  0x1e   :  { %p644_p0 = por %p643_p13, %p642_p12 }
  0x20   :  { %p645_p1 = pnand %p644_p0, %p638_p11 }
  0x22   :  { %648 = shalt.err (!%p645_p1)
}
  0x23   :  { %27 = dma.hbm_to_vmem [thread:$0]  %s870_s0, 256, %s770_s27, [#allocation3], %s725_s13, %s725_s13, %s726_s14  }
  0x24   :  { %s727_s26 = smov [#allocation7]   ;;  %s728_s29 = smov [#allocation8]  }
  0x25   :  { %s47_s28 = sshll.u32 %s727_s26, 4  ;;  %s61_s30 = sshll.u32 %s728_s29, 4  ;;  %s48_s28 = int_to_ptr.vmem [resolvable:$true] %s47_s28  ;;  %s807_s30 = int_to_ptr.vmem [resolvable:$true] %s61_s30 }
  0x26   :  { %s649_s10 = scalar_lea.hbm %s873_s3, 2048 }
  0x27   :  { %p650_p2 = scmp.ne.s32.totalorder %s873_s3, %s649_s10  ;;  %p653_p3 = scmp.lt.u32.totalorder %s649_s10, %s873_s3 }
  0x29   :  { %p655_p4 = pnand %p653_p3, %p650_p2 }
  0x2b   :  { %658 = shalt.err (!%p655_p4)
}
  0x2c   :  { %s659_s0 = scalar_lea.vmem %s48_s28, 2048  ;;  %p664_p6 = scmp.lt.s32.totalorder %s48_s28, %s48_s28 }
  0x2d   :  { %p660_p5 = scmp.ne.s32.totalorder %s48_s28, %s659_s0  ;;  %p665_p7 = scmp.lt.s32.totalorder %s659_s0, %s659_s0 }
  0x2f   :  { %p666_p8 = por %p665_p7, %p664_p6 }
  0x31   :  { %p667_p9 = pnand %p666_p8, %p660_p5 }
  0x33   :  { %670 = shalt.err (!%p667_p9)
}
  0x34   :  { %53 = dma.hbm_to_vmem [thread:$0]  %s873_s3, 2048, %s48_s28, [#allocation6], %s725_s13, %s725_s13, %s726_s14  }
  0x35   :  { %s671_s20 = scalar_lea.hbm %s875_s5, 2048 }
  0x36   :  { %p672_p10 = scmp.ne.s32.totalorder %s875_s5, %s671_s20  ;;  %p675_p11 = scmp.lt.u32.totalorder %s671_s20, %s875_s5 }
  0x38   :  { %p677_p12 = pnand %p675_p11, %p672_p10 }
  0x3a   :  { %680 = shalt.err (!%p677_p12)
}
  0x3b   :  { %s681_s1 = scalar_lea.vmem %s807_s30, 2048  ;;  %p686_p0 = scmp.lt.s32.totalorder %s807_s30, %s807_s30 }
  0x3c   :  { %p682_p13 = scmp.ne.s32.totalorder %s807_s30, %s681_s1  ;;  %p687_p1 = scmp.lt.s32.totalorder %s681_s1, %s681_s1 }
  0x3e   :  { %p688_p2 = por %p687_p1, %p686_p0 }
  0x40   :  { %p689_p3 = pnand %p688_p2, %p682_p13 }
  0x42   :  { %692 = shalt.err (!%p689_p3)
}
  0x43   :  { %67 = dma.hbm_to_vmem [thread:$0]  %s875_s5, 2048, %s807_s30, [#allocation9], %s725_s13, %s725_s13, %s726_s14  }
  0x44   :  { %715 = dma.done.wait [#allocation3], 256  }
  0x45   :  { %716 = vsyncadd [#allocation3], 4294967040 }
  0x46   :  { %717 = dma.done.wait [#allocation6], 2560  }
  0x47   :  { %718 = vsyncadd [#allocation6], 4294964736 }
  0x48   :  { %719 = dma.done.wait [#allocation9], 2048  }
  0x49   :  { %720 = vsyncadd [#allocation9], 4294965248  ;;  %vm95_vm0 = vcmask 261120   ;;  %v84_v0 = vld [vmem:[#allocation5] sm:$0xff]  ;;  %v85_v1 = vld [vmem:[#allocation5 + $0x8] sm:$0xff]  ;;  %s729_s8 = smov [#allocation10]  }
  0x4a   :  { %v86_v2 = vld [vmem:[#allocation5 + $0x10] sm:$0xff]  ;;  %v526_v3 = vpack.c.bf16 %v85_v1, %v84_v0  ;;  %v87_v4 = vld [vmem:[#allocation5 + $0x18] sm:$0xff]  ;;  %v179_v7 = vld [vmem:[#allocation7] sm:$0xff]  ;;  %s384_s9 = sshll.u32 %s729_s8, 4  ;;  %s385_s9 = int_to_ptr.vmem [resolvable:$true] %s384_s9 }
  0x4b   :  { %v82_v5 = vld [vmem:[#allocation2] sm:$0xff]  ;;  %v530_v6 = vpack.c.bf16 %v87_v4, %v86_v2  ;;  %v180_v8 = vld [vmem:[#allocation7 + $0x8] sm:$0xff]  ;;  %v182_v11 = vld [vmem:[#allocation7 + $0x18] sm:$0xff]  ;;  %p698_p5 = scmp.lt.s32.totalorder %s385_s9, %s385_s9 }
  0x4c   :  { %453 = vmatprep.mubr.msk.f32.mxu0 %vm95_vm0, %v82_v5  ;;  %v181_v9 = vld [vmem:[#allocation7 + $0x10] sm:$0xff]  ;;  %527 = vmatprep.subr.bf16.mxu0 %v526_v3  ;;  %v534_v10 = vpack.c.bf16 %v180_v8, %v179_v7  ;;  %v183_v13 = vld [vmem:[#allocation7 + $0x20] sm:$0xff]  ;;  %v184_v14 = vld [vmem:[#allocation7 + $0x28] sm:$0xff] }
  0x4d   :  { %529 = vmatpush3.bf16.msra.mxu0 %v526_v3  ;;  %v538_v12 = vpack.c.bf16 %v182_v11, %v181_v9  ;;  %v542_v15 = vpack.c.bf16 %v184_v14, %v183_v13  ;;  %v83_v16 = vld [vmem:[#allocation2 + $0x8] sm:$0xff]  ;;  %v185_v17 = vld [vmem:[#allocation7 + $0x30] sm:$0xff]  ;;  %v187_v20 = vld [vmem:[#allocation7 + $0x40] sm:$0xff] }
  0x4e   :  { %531 = vmatprep.subr.bf16.mxu0 %v530_v6  ;;  %535 = vmatprep.subr.bf16.mxu1 %v534_v10  ;;  %v186_v18 = vld [vmem:[#allocation7 + $0x38] sm:$0xff]  ;;  %v188_v21 = vld [vmem:[#allocation7 + $0x48] sm:$0xff]  ;;  %v189_v23 = vld [vmem:[#allocation7 + $0x50] sm:$0xff] }
  0x4f   :  { %537 = vmatpush3.bf16.msra.mxu1 %v534_v10  ;;  %v546_v19 = vpack.c.bf16 %v186_v18, %v185_v17  ;;  %v550_v22 = vpack.c.bf16 %v188_v21, %v187_v20  ;;  %v190_v24 = vld [vmem:[#allocation7 + $0x58] sm:$0xff]  ;;  %v191_v26 = vld [vmem:[#allocation7 + $0x60] sm:$0xff]  ;;  %v192_v27 = vld [vmem:[#allocation7 + $0x68] sm:$0xff] }
  0x50   :  { %539 = vmatprep.subr.bf16.mxu1 %v538_v12  ;;  %v554_v25 = vpack.c.bf16 %v190_v24, %v189_v23  ;;  %v558_v28 = vpack.c.bf16 %v192_v27, %v191_v26  ;;  %v193_v29 = vld [vmem:[#allocation7 + $0x70] sm:$0xff]  ;;  %v194_v30 = vld [vmem:[#allocation7 + $0x78] sm:$0xff]  ;;  %v279_v32 = vld [vmem:[#allocation8] sm:$0xff] }
  0x51   :  { %533 = vmatpush3.bf16.msra.mxu0 %v530_v6  ;;  %v562_v31 = vpack.c.bf16 %v194_v30, %v193_v29  ;;  %v280_v33 = vld [vmem:[#allocation8 + $0x8] sm:$0xff]  ;;  %v281_v34 = vld [vmem:[#allocation8 + $0x10] sm:$0xff]  ;;  %v282_v36 = vld [vmem:[#allocation8 + $0x18] sm:$0xff] }
  0x52   :  { %v566_v35 = vpack.c.bf16 %v280_v33, %v279_v32  ;;  %v570_v37 = vpack.c.bf16 %v282_v36, %v281_v34  ;;  %v283_v38 = vld [vmem:[#allocation8 + $0x20] sm:$0xff]  ;;  %v284_v39 = vld [vmem:[#allocation8 + $0x28] sm:$0xff]  ;;  %v285_v41 = vld [vmem:[#allocation8 + $0x30] sm:$0xff] }
  0x53   :  { %541 = vmatpush3.bf16.msra.mxu1 %v538_v12  ;;  %v574_v40 = vpack.c.bf16 %v284_v39, %v283_v38  ;;  %v286_v42 = vld [vmem:[#allocation8 + $0x38] sm:$0xff]  ;;  %v287_v44 = vld [vmem:[#allocation8 + $0x40] sm:$0xff]  ;;  %v288_v45 = vld [vmem:[#allocation8 + $0x48] sm:$0xff] }
  0x54   :  { %454 = vmatmul.mubr.msk.f32.vlgmr.msra.gmra.mrb[0].mxu0 %vm95_vm0, %v83_v16  ;;  %543 = vmatprep.subr.bf16.mxu1 %v542_v15  ;;  %v578_v43 = vpack.c.bf16 %v286_v42, %v285_v41  ;;  %v582_v46 = vpack.c.bf16 %v288_v45, %v287_v44  ;;  %v289_v47 = vld [vmem:[#allocation8 + $0x50] sm:$0xff]  ;;  %v290_v48 = vld [vmem:[#allocation8 + $0x58] sm:$0xff]  ;;  %v291_v50 = vld [vmem:[#allocation8 + $0x60] sm:$0xff] }
  0x55   :  { %567 = vmatprep.subr.bf16.mxu0 %v566_v35  ;;  %v586_v49 = vpack.c.bf16 %v290_v48, %v289_v47  ;;  %v292_v51 = vld [vmem:[#allocation8 + $0x68] sm:$0xff]  ;;  %v398_v53 = vld [vmem:[%s872_s2] ss:$0 sm:$0xff]  ;;  %v294_v61 = vld [vmem:[#allocation8 + $0x78] sm:$0xff] }
  0x56   :  { %569 = vmatpush3.bf16.msra.mxu0 %v566_v35  ;;  %v590_v52 = vpack.c.bf16 %v292_v51, %v291_v50  ;;  %v293_v60 = vld [vmem:[#allocation8 + $0x70] sm:$0xff] }
  0x57   :  { %545 = vmatpush3.bf16.msra.mxu1 %v542_v15  ;;  %571 = vmatprep.subr.bf16.mxu0 %v570_v37  ;;  %v594_v62 = vpack.c.bf16 %v294_v61, %v293_v60  ;;  %v401_v63 = vld [vmem:[%s874_s4] ss:$0 sm:$0xff]  ;;  %s693_s4 = scalar_lea.vmem %s385_s9, 256 }
  0x58   :  { %547 = vmatprep.subr.bf16.mxu1 %v546_v19  ;;  %v402_v6 = vld [vmem:[%s876_s6] ss:$0 sm:$0xff]  ;;  %p694_p4 = scmp.ne.s32.totalorder %s385_s9, %s693_s4  ;;  %p699_p6 = scmp.lt.s32.totalorder %s693_s4, %s693_s4 }
  0x5a   :  { %573 = vmatpush3.bf16.msra.mxu0 %v570_v37  ;;  %p700_p7 = por %p699_p6, %p698_p5 }
  0x5b   :  { %549 = vmatpush3.bf16.msra.mxu1 %v546_v19  ;;  %575 = vmatprep.subr.bf16.mxu0 %v574_v40 }
  0x5c   :  { %551 = vmatprep.subr.bf16.mxu1 %v550_v22  ;;  %p701_p8 = pnand %p700_p7, %p694_p4 }
  0x5e   :  { %577 = vmatpush3.bf16.msra.mxu0 %v574_v40 }
  0x5f   :  { %553 = vmatpush3.bf16.msra.mxu1 %v550_v22  ;;  %579 = vmatprep.subr.bf16.mxu0 %v578_v43 }
  0x60   :  { %555 = vmatprep.subr.bf16.mxu1 %v554_v25 }
  0x62   :  { %581 = vmatpush3.bf16.msra.mxu0 %v578_v43 }
  0x63   :  { %557 = vmatpush3.bf16.msra.mxu1 %v554_v25  ;;  %583 = vmatprep.subr.bf16.mxu0 %v582_v46 }
  0x64   :  { %559 = vmatprep.subr.bf16.mxu1 %v558_v28 }
  0x66   :  { %585 = vmatpush3.bf16.msra.mxu0 %v582_v46 }
  0x67   :  { %561 = vmatpush3.bf16.msra.mxu1 %v558_v28  ;;  %587 = vmatprep.subr.bf16.mxu0 %v586_v49 }
  0x68   :  { %563 = vmatprep.subr.bf16.mxu1 %v562_v31 }
  0x6a   :  { %589 = vmatpush3.bf16.msra.mxu0 %v586_v49 }
  0x6b   :  { %565 = vmatpush3.bf16.msra.mxu1 %v562_v31  ;;  %591 = vmatprep.subr.bf16.mxu0 %v590_v52 }
  0x6e   :  { %593 = vmatpush3.bf16.msra.mxu0 %v590_v52 }
  0x6f   :  { %595 = vmatprep.subr.bf16.mxu0 %v594_v62 }
  0x72   :  { %597 = vmatpush3.bf16.msra.mxu0 %v594_v62 }
 0x127   :  { %v455_v54 = vpop.f32.mrb[0].mxu0 }
 0x128   :  { %v174_v55 = vadd.f32 %v455_v54, %v398_v53  ;;  %v168_v56 = vpop.f32.mrb[1].mxu0 }
 0x129   :  { %v169_v57 = vadd.f32 %v398_v53, %v168_v56 }
 0x12a   :  { %v178_v59 = vmax.f32 %v174_v55, 0.0 }
 0x12b   :  { %v177_v58 = vmax.f32 %v169_v57, 0.0 }
 0x12d   :  { %488 = vmatprep.mubr.f32.mxu1 %v177_v58 }
 0x12e   :  { %489 = vmatmul.mubr.f32.vlgmr.msra.gmra.mrb[0].mxu1 %v178_v59 }
 0x201   :  { %v490_v0 = vpop.f32.mrb[0].mxu1 }
 0x202   :  { %v274_v1 = vadd.f32 %v490_v0, %v401_v63  ;;  %v268_v2 = vpop.f32.mrb[1].mxu1 }
 0x203   :  { %v269_v3 = vadd.f32 %v401_v63, %v268_v2 }
 0x204   :  { %v278_v5 = vmax.f32 %v274_v1, 0.0 }
 0x205   :  { %v277_v4 = vmax.f32 %v269_v3, 0.0 }
 0x207   :  { %523 = vmatprep.mubr.f32.mxu0 %v277_v4 }
 0x208   :  { %524 = vmatmul.mubr.f32.vlgmr.msra.gmra.mrb[2].mxu0 %v278_v5 }
 0x2db   :  { %v525_v7 = vpop.f32.mrb[2].mxu0 }
 0x2dc   :  { %v374_v8 = vadd.f32 %v525_v7, %v402_v6  ;;  %v368_v9 = vpop.f32.mrb[3].mxu0 }
 0x2dd   :  { %v369_v10 = vadd.f32 %v402_v6, %v368_v9 }
 0x2de   :  { %378 = vst [vmem:[#allocation10 + $0x8] sm:$0xff] %v374_v8 }
 0x2df   :  { %377 = vst [vmem:[#allocation10] sm:$0xff] %v369_v10 }
 0x2e0   :  { %704 = shalt.err (!%p701_p8)
}
 0x2e1   :  { %s705_s6 = scalar_lea.hbm %s877_s7, 256 }
 0x2e2   :  { %p706_p9 = scmp.ne.s32.totalorder %s877_s7, %s705_s6  ;;  %p709_p10 = scmp.lt.u32.totalorder %s705_s6, %s877_s7 }
 0x2e4   :  { %p711_p11 = pnand %p709_p10, %p706_p9 }
 0x2e6   :  { %714 = shalt.err (!%p711_p11)
}
 0x2e7   :  { %390 = dma.vmem_to_hbm [thread:$0]  %s385_s9, 256, %s877_s7, [#allocation4], %s725_s13, %s725_s13, %s726_s14  }
 0x2e8   :  { %721 = dma.done.wait [#allocation4], 256  }
 0x2e9   :  { %722 = vsyncadd [#allocation4], 4294967040 }
 0x2ea   :  { %394 = vsyncpa [#allocation3], 1 }
 0x2eb   :  { %395 = vsyncpa [#allocation6], 1 }
 0x2ec   :  { %396 = vsyncpa [#allocation9], 1 }
 0x2ed   :  { %397 = vsyncpa [#allocation4], 1 }

</bundles_post_ra>
